<compile_context>
chip_gen: v5e
topology: v5e:2x2
jax: 0.10.0
libtpu: 0.0.40
codegen_flags: <defaults>
</compile_context>

<pallas_src>
import math
import numpy as np
import jax
import jax.numpy as jnp
from jax import lax
from jax.experimental import pallas as pl
from jax.experimental.pallas import tpu as pltpu

NUM_ENC = 5                                  # positional_encoding_1(..., 5)
COND_DIM = 10                                # 2 (encoded) + 8 (passthrough)
MLP_IN = 2 + 4 * NUM_ENC + (COND_DIM - 2)    # 30
HIDDEN = 32
MLP_OUT = 5

# flash-attention style dim numbers: contract dim 1 of both operands -> (M, N)
_TRANS_B = (((1,), (1,)), ((), ()))


def _cdiv(a, b):
    return -(-a // b)


def _round_up(x, m):
    return _cdiv(x, m) * m


def _x_perm():
    """kernel x row j  ->  reference x column perm[j].

    Kernel x rows : [sin freq-major (10), cos freq-major (10), ang (2), rest (8),
                     wi (2, multiplied by zero weight rows)]
    Reference cols: [ang(2), sin(f0)(2), cos(f0)(2), sin(f1)(2), ..., cond[:, :8]]
    """
    perm = [2 + 4 * i + c for i in range(NUM_ENC) for c in range(2)]   # sin rows 0..9
    perm += [4 + 4 * i + c for i in range(NUM_ENC) for c in range(2)]  # cos rows 10..19
    perm += [0, 1]                                                     # ang rows 20,21
    perm += list(range(2 + 4 * NUM_ENC, MLP_IN))                       # rest rows 22..29
    return np.array(perm, np.int32)


def _make_embed():
    """Selection/frequency matrices that transpose + scatter the inputs on the MXU.

    pre (32, tb) = ec @ cond^T + ew @ wi^T with rows:
      0..9   : phase (freq-major)  2^i * ang_c      (for sin)
      10..19 : phase (duplicate)                    (for cos)
      20..21 : ang
      22..29 : cond[:, :8] passthrough
      30..31 : wi (epilogue only; w0 rows are zero there)
    All entries are powers of two, so the matmul is exact.
    """
    ec = np.zeros((HIDDEN, COND_DIM), np.float32)   # (32, 10)
    ew = np.zeros((HIDDEN, 2), np.float32)          # (32, 2)
    for i in range(NUM_ENC):
        for c in range(2):
            ec[2 * i + c, 8 + c] = 2.0 ** i          # sin phases
            ec[10 + 2 * i + c, 8 + c] = 2.0 ** i     # cos phases
    ec[20, 8] = 1.0
    ec[21, 9] = 1.0                                  # ang
    for k in range(8):
        ec[22 + k, k] = 1.0                          # rest passthrough
    ew[30, 0] = 1.0
    ew[31, 1] = 1.0                                  # wi passthrough
    return jnp.asarray(ew), jnp.asarray(ec)


def _pack_params(params):
    """Pack the 4 (w, b) pairs, pre-transposed and zero-padded to 32x32 / (32,1).

    w0's columns (i.e. original rows) are permuted to match the kernel's x row
    order, so  W0k @ x_kernel == (x_reference @ W0)^T  exactly.
    """
    w0, b0, w1, b1, w2, b2, w3, b3 = params
    perm = _x_perm()
    w0k = jnp.zeros((HIDDEN, HIDDEN), jnp.float32).at[:, :MLP_IN].set(
        jnp.transpose(w0[perm, :]))                                     # (32, 32)
    w1k = jnp.transpose(w1)
    w2k = jnp.transpose(w2)
    w3k = jnp.zeros((HIDDEN, HIDDEN), jnp.float32).at[:MLP_OUT, :].set(
        jnp.transpose(w3))
    wpack = jnp.stack([w0k, w1k, w2k, w3k], axis=0)                     # (4, 32, 32)

    b3k = jnp.zeros((HIDDEN,), jnp.float32).at[:MLP_OUT].set(jnp.reshape(b3, (-1,)))
    bpack = jnp.stack([jnp.reshape(b0, (-1,)), jnp.reshape(b1, (-1,)),
                       jnp.reshape(b2, (-1,)), b3k], axis=0)
    bpack = jnp.reshape(bpack, (4, HIDDEN, 1))                          # (4, 32, 1)
    return wpack, bpack


def _tile_and_grid(B):
    """Pick (tile, grid).  Small B: one full block.  Large B: even, 128-aligned."""
    if B <= 1024:
        return B, 1
    k = max(1, _cdiv(B, 2 * 2048))
    tb = _round_up(_cdiv(B, 2 * k), 128)
    return tb, _cdiv(B, tb)


def baseline_kernel(wi_ref, cond_ref, ew_ref, ec_ref, wpack_ref, bpack_ref, pdf_ref):
    # --- MXU transpose + scatter + frequency scaling --------------------------
    # pre (32, tb): [phase(10) | phase(10) | ang(2) | rest(8) | wi(2)], batch on lanes.
    pre = (lax.dot_general(ec_ref[...], cond_ref[...], _TRANS_B,
                           preferred_element_type=jnp.float32)
           + lax.dot_general(ew_ref[...], wi_ref[...], _TRANS_B,
                             preferred_element_type=jnp.float32))

    # --- positional encoding: one sin + one cos, sublane concat ---------------
    x = jnp.concatenate([jnp.sin(pre[0:10, :]),
                         jnp.cos(pre[10:20, :]),
                         pre[20:32, :]], axis=0)          # (32, tb)

    # --- MLP: (32,32) @ (32,tb) per layer, biases broadcast over lanes --------
    h = jnp.maximum(jnp.dot(wpack_ref[0], x, preferred_element_type=jnp.float32)
                    + bpack_ref[0], 0.0)
    h = jnp.maximum(jnp.dot(wpack_ref[1], h, preferred_element_type=jnp.float32)
                    + bpack_ref[1], 0.0)
    h = jnp.maximum(jnp.dot(wpack_ref[2], h, preferred_element_type=jnp.float32)
                    + bpack_ref[2], 0.0)
    ret = jnp.dot(wpack_ref[3], h, preferred_element_type=jnp.float32) + bpack_ref[3]

    # --- GMM + uniform-disk pdf (lane-dense (1,tb)/(2,tb) shapes) --------------
    mu = ret[0:2, :]                        # (2, tb)
    log_sigma = ret[2:3, :]                 # (1, tb)
    inv_sigma = jnp.exp(-log_sigma)         # 1/sigma
    wg = jnp.abs(ret[3:4, :])               # gaussian mixture weight (unnormalized)
    wd = jnp.abs(ret[4:5, :])               # uniform-disk mixture weight
    inv_wsum = pl.reciprocal(jnp.maximum(wg + wd, 1e-12), approx=False)

    wi_t = pre[30:32, :]                    # (2, tb)
    d = (wi_t - mu) * inv_sigma
    rr = d[0:1, :] * d[0:1, :] + d[1:2, :] * d[1:2, :]
    gauss = jnp.exp(-0.5 * rr) * (inv_sigma * inv_sigma) * jnp.float32(1.0 / (2.0 * math.pi))

    r2 = wi_t[0:1, :] * wi_t[0:1, :] + wi_t[1:2, :] * wi_t[1:2, :]
    in_disk = jnp.where(r2 <= 1.0, jnp.float32(1.0 / math.pi), jnp.float32(0.0))

    pdf_ref[...] = (wg * gauss + wd * in_disk) * inv_wsum   # (1, tb) lane-dense store


def baseline_forward(wi, cond, params):
    """BaseLine.forward(wi, cond, inverse=False) via a Pallas TPU kernel."""
    B = wi.shape[0]
    tb, grid = _tile_and_grid(B)
    ew, ec = _make_embed()
    wpack, bpack = _pack_params(params)

    def const_spec(a):
        return pl.BlockSpec(a.shape, lambda i: (0,) * a.ndim)

    pdf2d = pl.pallas_call(
        baseline_kernel,
        out_shape=jax.ShapeDtypeStruct((1, B), jnp.float32),
        grid_spec=pltpu.PrefetchScalarGridSpec(
            num_scalar_prefetch=0,
            grid=(grid,),
            in_specs=[
                pl.BlockSpec((tb, 2), lambda i: (i, 0)),          # wi   (row-major)
                pl.BlockSpec((tb, COND_DIM), lambda i: (i, 0)),   # cond (row-major)
                const_spec(ew), const_spec(ec),                   # resident constants
                const_spec(wpack), const_spec(bpack),
            ],
            out_specs=pl.BlockSpec((1, tb), lambda i: (0, i)),    # lane-dense output
        ),
        compiler_params=pltpu.CompilerParams(
            dimension_semantics=("parallel",)),
    )(wi, cond, ew, ec, wpack, bpack)

    # inverse=False: wi passes through unchanged
    return wi, pdf2d[0]


def init_params(key):
    """Deterministic init mimicking nn.Linear shapes: mlp(30, [32]*3, 5)."""
    dims = [(MLP_IN, HIDDEN), (HIDDEN, HIDDEN), (HIDDEN, HIDDEN), (HIDDEN, MLP_OUT)]
    params = []
    for (din, dout) in dims:
        key, k1, k2 = jax.random.split(key, 3)
        bound = 1.0 / math.sqrt(din)
        w = jax.random.uniform(k1, (din, dout), jnp.float32, -bound, bound)
        b = jax.random.uniform(k2, (1, dout), jnp.float32, -bound, bound)
        params += [w, b]
    return tuple(params)


def baseline_ref(wi, cond, params):
    """Pure-JAX reference (matches the PyTorch module exactly, reference order)."""
    (w0, b0, w1, b1, w2, b2, w3, b3) = params
    ang = cond[:, -2:]
    feats = [ang]
    for i in range(NUM_ENC):
        freq = 2.0 ** i
        feats.append(jnp.sin(ang * freq))
        feats.append(jnp.cos(ang * freq))
    feats.append(cond[:, :-2])
    x = jnp.concatenate(feats, axis=-1)
    h = jnp.maximum(x @ w0 + b0, 0.0)
    h = jnp.maximum(h @ w1 + b1, 0.0)
    h = jnp.maximum(h @ w2 + b2, 0.0)
    ret = h @ w3 + b3
    mu = ret[:, :2]
    log_sigma = ret[:, 2:3]
    sigma = jnp.exp(log_sigma)
    weight = jnp.abs(ret[:, 3:])
    weight = weight / jnp.maximum(weight.sum(-1, keepdims=True), 1e-12)
    rr = (((wi - mu) / sigma) ** 2).sum(-1)
    fac = jnp.exp(-log_sigma[:, 0] * 2.0) / (2.0 * math.pi)
    pdf = weight[:, 0] * jnp.exp(-0.5 * rr) * fac
    pdf = pdf + weight[:, -1] * ((wi ** 2).sum(-1) <= 1.0).astype(jnp.float32) / math.pi
    return wi, pdf


if __name__ == "__main__":
    key = jax.random.PRNGKey(0)
    kp, _ = jax.random.split(key)
    params = init_params(kp)

    # 64: aligned single block; 100: non-multiple-of-8 single block;
    # 2600: multi-block grid with a ragged (masked) tail.
    for B in (64, 100, 2600):
        kw_b, kc_b = jax.random.split(jax.random.fold_in(key, B))
        wi = jax.random.uniform(kw_b, (B, 2), jnp.float32, -1.0, 1.0)
        cond = jax.random.uniform(kc_b, (B, COND_DIM), jnp.float32, -1.0, 1.0)

        wi_out, pdf = baseline_forward(wi, cond, params)
        jax.block_until_ready(pdf)

        wi_r, pdf_r = baseline_ref(wi, cond, params)
        assert jnp.allclose(wi_out, wi_r), f"wi mismatch at B={B}"
        assert jnp.allclose(pdf, pdf_r, atol=1e-5, rtol=1e-4), (
            f"pdf mismatch at B={B}: max abs err {jnp.max(jnp.abs(pdf - pdf_r))}")

    print("KERNEL_OK")
</pallas_src>

<mosaic_0001>
module attributes {stable_mosaic.version = 11 : i64} {
  func.func @baseline_kernel(%arg0: i32, %arg1: memref<64x2xf32, #tpu.memory_space<vmem>>, %arg2: memref<64x10xf32, #tpu.memory_space<vmem>>, %arg3: memref<32x2xf32, #tpu.memory_space<vmem>>, %arg4: memref<32x10xf32, #tpu.memory_space<vmem>>, %arg5: memref<4x32x32xf32, #tpu.memory_space<vmem>>, %arg6: memref<4x32x1xf32, #tpu.memory_space<vmem>>, %arg7: memref<1x64xf32, #tpu.memory_space<vmem>>) attributes {dimension_semantics = [#tpu.dimension_semantics<parallel>], iteration_bounds = array<i64: 1>, scalar_prefetch = 0 : i64, scratch_operands = 0 : i64, tpu.core_type = #tpu.core_type<tc>, window_params = [{transform_indices = @transform_0, window_bounds = array<i64: 64, 2>}, {transform_indices = @transform_1, window_bounds = array<i64: 64, 10>}, {pipeline_mode = #tpu.pipeline_mode<synchronous>, transform_indices = @transform_2, window_bounds = array<i64: 32, 2>}, {pipeline_mode = #tpu.pipeline_mode<synchronous>, transform_indices = @transform_3, window_bounds = array<i64: 32, 10>}, {pipeline_mode = #tpu.pipeline_mode<synchronous>, transform_indices = @transform_4, window_bounds = array<i64: 4, 32, 32>}, {pipeline_mode = #tpu.pipeline_mode<synchronous>, transform_indices = @transform_5, window_bounds = array<i64: 4, 32, 1>}, {transform_indices = @transform_6, window_bounds = array<i64: 1, 64>}]} {
    %c0 = arith.constant 0 : index
    %c0_0 = arith.constant 0 : index
    %0 = vector.load %arg4[%c0, %c0_0] : memref<32x10xf32, #tpu.memory_space<vmem>>, vector<32x10xf32>
    %c0_1 = arith.constant 0 : index
    %c0_2 = arith.constant 0 : index
    %1 = vector.load %arg2[%c0_1, %c0_2] : memref<64x10xf32, #tpu.memory_space<vmem>>, vector<64x10xf32>
    %cst = arith.constant dense<0.000000e+00> : vector<32x64xf32>
    %2 = tpu.matmul %0, %1, %cst {dimension_numbers = #tpu.dot_dimension_numbers<[1], [1], [0], [0], [0, 0, 1, 0], [], []>} : vector<32x10xf32>, vector<64x10xf32>, vector<32x64xf32> -> vector<32x64xf32>
    %c0_3 = arith.constant 0 : index
    %c0_4 = arith.constant 0 : index
    %3 = vector.load %arg3[%c0_3, %c0_4] : memref<32x2xf32, #tpu.memory_space<vmem>>, vector<32x2xf32>
    %c0_5 = arith.constant 0 : index
    %c0_6 = arith.constant 0 : index
    %4 = vector.load %arg1[%c0_5, %c0_6] : memref<64x2xf32, #tpu.memory_space<vmem>>, vector<64x2xf32>
    %cst_7 = arith.constant dense<0.000000e+00> : vector<32x64xf32>
    %5 = tpu.matmul %3, %4, %cst_7 {dimension_numbers = #tpu.dot_dimension_numbers<[1], [1], [0], [0], [0, 0, 1, 0], [], []>} : vector<32x2xf32>, vector<64x2xf32>, vector<32x64xf32> -> vector<32x64xf32>
    %6 = arith.addf %2, %5 : vector<32x64xf32>
    %7 = vector.extract_strided_slice %6 {offsets = [0, 0], sizes = [10, 64], strides = [1, 1]} : vector<32x64xf32> to vector<10x64xf32>
    %8 = math.sin %7 : vector<10x64xf32>
    %9 = vector.extract_strided_slice %6 {offsets = [10, 0], sizes = [10, 64], strides = [1, 1]} : vector<32x64xf32> to vector<10x64xf32>
    %10 = math.cos %9 : vector<10x64xf32>
    %11 = vector.extract_strided_slice %6 {offsets = [20, 0], sizes = [12, 64], strides = [1, 1]} : vector<32x64xf32> to vector<12x64xf32>
    %12 = tpu.concatenate %8, %10, %11 in 0 : vector<10x64xf32>, vector<10x64xf32>, vector<12x64xf32> -> vector<32x64xf32>
    %c0_8 = arith.constant 0 : index
    %c0_9 = arith.constant 0 : index
    %c0_10 = arith.constant 0 : index
    %13 = vector.load %arg5[%c0_8, %c0_9, %c0_10] : memref<4x32x32xf32, #tpu.memory_space<vmem>>, vector<1x32x32xf32>
    %14 = vector.shape_cast %13 : vector<1x32x32xf32> to vector<32x32xf32>
    %cst_11 = arith.constant dense<0.000000e+00> : vector<32x64xf32>
    %15 = tpu.matmul %14, %12, %cst_11 {dimension_numbers = #tpu.dot_dimension_numbers<[1], [0], [0], [1], [0, 0, 1, 1], [], []>} : vector<32x32xf32>, vector<32x64xf32>, vector<32x64xf32> -> vector<32x64xf32>
    %c0_12 = arith.constant 0 : index
    %c0_13 = arith.constant 0 : index
    %c0_14 = arith.constant 0 : index
    %16 = vector.load %arg6[%c0_12, %c0_13, %c0_14] : memref<4x32x1xf32, #tpu.memory_space<vmem>>, vector<1x32x1xf32>
    %17 = vector.shape_cast %16 : vector<1x32x1xf32> to vector<32x1xf32>
    %18 = vector.broadcast %17 : vector<32x1xf32> to vector<32x64xf32>
    %19 = arith.addf %15, %18 : vector<32x64xf32>
    %cst_15 = arith.constant 0.000000e+00 : f32
    %20 = vector.broadcast %cst_15 : f32 to vector<32x64xf32>
    %21 = arith.maximumf %19, %20 : vector<32x64xf32>
    %c1 = arith.constant 1 : index
    %c0_16 = arith.constant 0 : index
    %c0_17 = arith.constant 0 : index
    %22 = vector.load %arg5[%c1, %c0_16, %c0_17] : memref<4x32x32xf32, #tpu.memory_space<vmem>>, vector<1x32x32xf32>
    %23 = vector.shape_cast %22 : vector<1x32x32xf32> to vector<32x32xf32>
    %cst_18 = arith.constant dense<0.000000e+00> : vector<32x64xf32>
    %24 = tpu.matmul %23, %21, %cst_18 {dimension_numbers = #tpu.dot_dimension_numbers<[1], [0], [0], [1], [0, 0, 1, 1], [], []>} : vector<32x32xf32>, vector<32x64xf32>, vector<32x64xf32> -> vector<32x64xf32>
    %c1_19 = arith.constant 1 : index
    %c0_20 = arith.constant 0 : index
    %c0_21 = arith.constant 0 : index
    %25 = vector.load %arg6[%c1_19, %c0_20, %c0_21] : memref<4x32x1xf32, #tpu.memory_space<vmem>>, vector<1x32x1xf32>
    %26 = vector.shape_cast %25 : vector<1x32x1xf32> to vector<32x1xf32>
    %27 = vector.broadcast %26 : vector<32x1xf32> to vector<32x64xf32>
    %28 = arith.addf %24, %27 : vector<32x64xf32>
    %cst_22 = arith.constant 0.000000e+00 : f32
    %29 = vector.broadcast %cst_22 : f32 to vector<32x64xf32>
    %30 = arith.maximumf %28, %29 : vector<32x64xf32>
    %c2 = arith.constant 2 : index
    %c0_23 = arith.constant 0 : index
    %c0_24 = arith.constant 0 : index
    %31 = vector.load %arg5[%c2, %c0_23, %c0_24] : memref<4x32x32xf32, #tpu.memory_space<vmem>>, vector<1x32x32xf32>
    %32 = vector.shape_cast %31 : vector<1x32x32xf32> to vector<32x32xf32>
    %cst_25 = arith.constant dense<0.000000e+00> : vector<32x64xf32>
    %33 = tpu.matmul %32, %30, %cst_25 {dimension_numbers = #tpu.dot_dimension_numbers<[1], [0], [0], [1], [0, 0, 1, 1], [], []>} : vector<32x32xf32>, vector<32x64xf32>, vector<32x64xf32> -> vector<32x64xf32>
    %c2_26 = arith.constant 2 : index
    %c0_27 = arith.constant 0 : index
    %c0_28 = arith.constant 0 : index
    %34 = vector.load %arg6[%c2_26, %c0_27, %c0_28] : memref<4x32x1xf32, #tpu.memory_space<vmem>>, vector<1x32x1xf32>
    %35 = vector.shape_cast %34 : vector<1x32x1xf32> to vector<32x1xf32>
    %36 = vector.broadcast %35 : vector<32x1xf32> to vector<32x64xf32>
    %37 = arith.addf %33, %36 : vector<32x64xf32>
    %cst_29 = arith.constant 0.000000e+00 : f32
    %38 = vector.broadcast %cst_29 : f32 to vector<32x64xf32>
    %39 = arith.maximumf %37, %38 : vector<32x64xf32>
    %c3 = arith.constant 3 : index
    %c0_30 = arith.constant 0 : index
    %c0_31 = arith.constant 0 : index
    %40 = vector.load %arg5[%c3, %c0_30, %c0_31] : memref<4x32x32xf32, #tpu.memory_space<vmem>>, vector<1x32x32xf32>
    %41 = vector.shape_cast %40 : vector<1x32x32xf32> to vector<32x32xf32>
    %cst_32 = arith.constant dense<0.000000e+00> : vector<32x64xf32>
    %42 = tpu.matmul %41, %39, %cst_32 {dimension_numbers = #tpu.dot_dimension_numbers<[1], [0], [0], [1], [0, 0, 1, 1], [], []>} : vector<32x32xf32>, vector<32x64xf32>, vector<32x64xf32> -> vector<32x64xf32>
    %c3_33 = arith.constant 3 : index
    %c0_34 = arith.constant 0 : index
    %c0_35 = arith.constant 0 : index
    %43 = vector.load %arg6[%c3_33, %c0_34, %c0_35] : memref<4x32x1xf32, #tpu.memory_space<vmem>>, vector<1x32x1xf32>
    %44 = vector.shape_cast %43 : vector<1x32x1xf32> to vector<32x1xf32>
    %45 = vector.broadcast %44 : vector<32x1xf32> to vector<32x64xf32>
    %46 = arith.addf %42, %45 : vector<32x64xf32>
    %47 = vector.extract_strided_slice %46 {offsets = [0, 0], sizes = [2, 64], strides = [1, 1]} : vector<32x64xf32> to vector<2x64xf32>
    %48 = vector.extract_strided_slice %46 {offsets = [2, 0], sizes = [1, 64], strides = [1, 1]} : vector<32x64xf32> to vector<1x64xf32>
    %cst_36 = arith.constant 0.000000e+00 : f32
    %49 = vector.broadcast %cst_36 : f32 to vector<1x64xf32>
    %50 = arith.subf %49, %48 : vector<1x64xf32>
    %51 = math.exp %50 : vector<1x64xf32>
    %52 = vector.extract_strided_slice %46 {offsets = [3, 0], sizes = [1, 64], strides = [1, 1]} : vector<32x64xf32> to vector<1x64xf32>
    %53 = math.absf %52 : vector<1x64xf32>
    %54 = vector.extract_strided_slice %46 {offsets = [4, 0], sizes = [1, 64], strides = [1, 1]} : vector<32x64xf32> to vector<1x64xf32>
    %55 = math.absf %54 : vector<1x64xf32>
    %56 = arith.addf %53, %55 : vector<1x64xf32>
    %cst_37 = arith.constant 9.99999996E-13 : f32
    %57 = vector.broadcast %cst_37 : f32 to vector<1x64xf32>
    %58 = arith.maximumf %56, %57 : vector<1x64xf32>
    %59 = tpu.reciprocal %58 : vector<1x64xf32> -> vector<1x64xf32>
    %60 = vector.extract_strided_slice %6 {offsets = [30, 0], sizes = [2, 64], strides = [1, 1]} : vector<32x64xf32> to vector<2x64xf32>
    %61 = arith.subf %60, %47 : vector<2x64xf32>
    %62 = vector.broadcast %51 : vector<1x64xf32> to vector<2x64xf32>
    %63 = arith.mulf %61, %62 : vector<2x64xf32>
    %64 = vector.extract_strided_slice %63 {offsets = [0, 0], sizes = [1, 64], strides = [1, 1]} : vector<2x64xf32> to vector<1x64xf32>
    %65 = vector.extract_strided_slice %63 {offsets = [0, 0], sizes = [1, 64], strides = [1, 1]} : vector<2x64xf32> to vector<1x64xf32>
    %66 = arith.mulf %64, %65 : vector<1x64xf32>
    %67 = vector.extract_strided_slice %63 {offsets = [1, 0], sizes = [1, 64], strides = [1, 1]} : vector<2x64xf32> to vector<1x64xf32>
    %68 = vector.extract_strided_slice %63 {offsets = [1, 0], sizes = [1, 64], strides = [1, 1]} : vector<2x64xf32> to vector<1x64xf32>
    %69 = arith.mulf %67, %68 : vector<1x64xf32>
    %70 = arith.addf %66, %69 : vector<1x64xf32>
    %cst_38 = arith.constant -5.000000e-01 : f32
    %71 = vector.broadcast %cst_38 : f32 to vector<1x64xf32>
    %72 = arith.mulf %71, %70 : vector<1x64xf32>
    %73 = math.exp %72 : vector<1x64xf32>
    %74 = arith.mulf %51, %51 : vector<1x64xf32>
    %75 = arith.mulf %73, %74 : vector<1x64xf32>
    %cst_39 = arith.constant 0.159154937 : f32
    %76 = vector.broadcast %cst_39 : f32 to vector<1x64xf32>
    %77 = arith.mulf %75, %76 : vector<1x64xf32>
    %78 = vector.extract_strided_slice %60 {offsets = [0, 0], sizes = [1, 64], strides = [1, 1]} : vector<2x64xf32> to vector<1x64xf32>
    %79 = vector.extract_strided_slice %60 {offsets = [0, 0], sizes = [1, 64], strides = [1, 1]} : vector<2x64xf32> to vector<1x64xf32>
    %80 = arith.mulf %78, %79 : vector<1x64xf32>
    %81 = vector.extract_strided_slice %60 {offsets = [1, 0], sizes = [1, 64], strides = [1, 1]} : vector<2x64xf32> to vector<1x64xf32>
    %82 = vector.extract_strided_slice %60 {offsets = [1, 0], sizes = [1, 64], strides = [1, 1]} : vector<2x64xf32> to vector<1x64xf32>
    %83 = arith.mulf %81, %82 : vector<1x64xf32>
    %84 = arith.addf %80, %83 : vector<1x64xf32>
    %cst_40 = arith.constant 1.000000e+00 : f32
    %85 = vector.broadcast %cst_40 : f32 to vector<1x64xf32>
    %86 = arith.cmpf ole, %84, %85 : vector<1x64xf32>
    %cst_41 = arith.constant 0.318309873 : f32
    %cst_42 = arith.constant 0.000000e+00 : f32
    %87 = vector.broadcast %cst_41 : f32 to vector<1x64xf32>
    %88 = vector.broadcast %cst_42 : f32 to vector<1x64xf32>
    %89 = arith.select %86, %87, %88 : vector<1x64xi1>, vector<1x64xf32>
    %90 = arith.mulf %53, %77 : vector<1x64xf32>
    %91 = arith.mulf %55, %89 : vector<1x64xf32>
    %92 = arith.addf %90, %91 : vector<1x64xf32>
    %93 = arith.mulf %92, %59 : vector<1x64xf32>
    %c0_43 = arith.constant 0 : index
    %c0_44 = arith.constant 0 : index
    %94 = vector.load %arg7[%c0_43, %c0_44] : memref<1x64xf32, #tpu.memory_space<vmem>>, vector<1x64xf32>
    tpu.vector_store %arg7[%c0_43, %c0_44], %93 {strides = array<i32>} : memref<1x64xf32, #tpu.memory_space<vmem>>, vector<1x64xf32>,
    return
  }
  func.func @transform_0(%arg0: i32) -> (i32, i32) {
    %c0_i32 = arith.constant 0 : i32
    %c0_i32_0 = arith.constant 0 : i32
    return %arg0, %c0_i32 : i32, i32
  }
  func.func @transform_1(%arg0: i32) -> (i32, i32) {
    %c0_i32 = arith.constant 0 : i32
    %c0_i32_0 = arith.constant 0 : i32
    return %arg0, %c0_i32 : i32, i32
  }
  func.func @transform_2(%arg0: i32) -> (i32, i32) {
    %c0_i32 = arith.constant 0 : i32
    %c0_i32_0 = arith.constant 0 : i32
    %c0_i32_1 = arith.constant 0 : i32
    return %c0_i32, %c0_i32_0 : i32, i32
  }
  func.func @transform_3(%arg0: i32) -> (i32, i32) {
    %c0_i32 = arith.constant 0 : i32
    %c0_i32_0 = arith.constant 0 : i32
    %c0_i32_1 = arith.constant 0 : i32
    return %c0_i32, %c0_i32_0 : i32, i32
  }
  func.func @transform_4(%arg0: i32) -> (i32, i32, i32) {
    %c0_i32 = arith.constant 0 : i32
    %c0_i32_0 = arith.constant 0 : i32
    %c0_i32_1 = arith.constant 0 : i32
    %c0_i32_2 = arith.constant 0 : i32
    return %c0_i32, %c0_i32_0, %c0_i32_1 : i32, i32, i32
  }
  func.func @transform_5(%arg0: i32) -> (i32, i32, i32) {
    %c0_i32 = arith.constant 0 : i32
    %c0_i32_0 = arith.constant 0 : i32
    %c0_i32_1 = arith.constant 0 : i32
    %c0_i32_2 = arith.constant 0 : i32
    return %c0_i32, %c0_i32_0, %c0_i32_1 : i32, i32, i32
  }
  func.func @transform_6(%arg0: i32) -> (i32, i32) {
    %c0_i32 = arith.constant 0 : i32
    %c0_i32_0 = arith.constant 0 : i32
    return %c0_i32, %arg0 : i32, i32
  }
}

</mosaic_0001>

<bundles_post_ra>
// kernel: tpu_custom_call.1
= control target key start
LH: loop header
LB: loop body
LE: loop exit
PB: predicated region body
PF: predicated region fallthrough
CT: control target
= control target key end

     0   :  { %vm48_vm0 = vcmask 15360   ;;  %vm114_vm1 = vcmask 80896   ;;  %s1893_s0 = inlined_call_operand.vmem [shape: f32[64,2], index: 0, kind: input, shape index: {}]   ;;  %s1894_s1 = inlined_call_operand.vmem [shape: f32[64,10], index: 1, kind: input, shape index: {}]   ;;  %s1895_s2 = inlined_call_operand.vmem [shape: f32[32,2], index: 2, kind: input, shape index: {}]   ;;  %s1896_s3 = inlined_call_operand.vmem [shape: f32[32,10], index: 3, kind: input, shape index: {}]   ;;  %s1897_s4 = inlined_call_operand.vmem [shape: f32[4,32,32], index: 4, kind: input, shape index: {}]   ;;  %s1898_s5 = inlined_call_operand.vmem [shape: f32[4,32,1], index: 5, kind: input, shape index: {}]   ;;  %s1899_s6 = inlined_call_operand.hbm [shape: f32[1,64], index: 6, kind: output, shape index: {}]  }
   0x1   :  { %v47_v0 = vld [vmem:[%s1893_s0 + $0x38] sm:$0xff]  ;;  %v46_v2 = vld [vmem:[%s1893_s0 + $0x30] sm:$0xff]  ;;  %v45_v4 = vld [vmem:[%s1893_s0 + $0x28] sm:$0xff] }
   0x2   :  { %v35_v1 = vld [vmem:[%s1894_s1 + $0x38] sm:$0xff]  ;;  %1172 = vmatpush.xpose.msk.msra.mxu0 %vm48_vm0, %v47_v0  ;;  %v34_v3 = vld [vmem:[%s1894_s1 + $0x30] sm:$0xff]  ;;  %v33_v5 = vld [vmem:[%s1894_s1 + $0x28] sm:$0xff] }
   0x3   :  { %1184 = vmatpush.xpose.msk.msra.mxu1 %vm114_vm1, %v35_v1 }
   0x6   :  { %1173 = vmatpush.xpose.msk.msra.mxu0 %vm48_vm0, %v46_v2 }
   0x7   :  { %1185 = vmatpush.xpose.msk.msra.mxu1 %vm114_vm1, %v34_v3 }
   0x8   :  { %11 = vsyncpa [#allocation3], 0  ;;  %v44_v6 = vld [vmem:[%s1893_s0 + $0x20] sm:$0xff]  ;;  %v43_v8 = vld [vmem:[%s1893_s0 + $0x18] sm:$0xff]  ;;  %v1292_v24 = vmov 0   ;;  %s1163_s21 = sshll.u32 %s1899_s6, 4  ;;  %s1164_s21 = int_to_ptr.hbm [resolvable:$true] %s1163_s21 }
   0x9   :  { %v32_v7 = vld [vmem:[%s1894_s1 + $0x20] sm:$0xff]  ;;  %v31_v9 = vld [vmem:[%s1894_s1 + $0x18] sm:$0xff]  ;;  %v42_v10 = vld [vmem:[%s1893_s0 + $0x10] sm:$0xff]  ;;  %1257 = vset.pattern.permute.xlu0 %v1292_v24  ;;  %1258 = vset.pattern.permute.xlu1 %v1292_v24  ;;  %v1293_v51 = vmov 920167782  }
   0xa   :  { %1174 = vmatpush.xpose.msk.msra.mxu0 %vm48_vm0, %v45_v4  ;;  %v30_v11 = vld [vmem:[%s1894_s1 + $0x10] sm:$0xff]  ;;  %v41_v12 = vld [vmem:[%s1893_s0 + $0x8] sm:$0xff]  ;;  %v40_v14 = vld [vmem:[%s1893_s0] sm:$0xff]  ;;  %1259 = vset.pattern.permute.xlu2 %v1292_v24  ;;  %v1294_v57 = vmov 2102212464  }
   0xb   :  { %1186 = vmatpush.xpose.msk.msra.mxu1 %vm114_vm1, %v33_v5  ;;  %v29_v13 = vld [vmem:[%s1894_s1 + $0x8] sm:$0xff]  ;;  %v28_v15 = vld [vmem:[%s1894_s1] sm:$0xff]  ;;  %v38_v20 = vld [vmem:[%s1895_s2 + $0x10] sm:$0xff]  ;;  %v1295_v61 = vmov 1326507024  }
   0xc   :  { %v36_v16 = vld [vmem:[%s1895_s2] sm:$0xff]  ;;  %v37_v18 = vld [vmem:[%s1895_s2 + $0x8] sm:$0xff]  ;;  %v26_v21 = vld [vmem:[%s1896_s3 + $0x10] sm:$0xff]  ;;  %v1296_v0 = vmov 683565275  }
   0xd   :  { %v24_v17 = vld [vmem:[%s1896_s3] sm:$0xff]  ;;  %v25_v19 = vld [vmem:[%s1896_s3 + $0x8] sm:$0xff]  ;;  %v39_v22 = vld [vmem:[%s1895_s2 + $0x18] sm:$0xff]  ;;  %v1297_v2 = vmov 2475754826  }
   0xe   :  { %1175 = vmatpush.xpose.msk.msra.mxu0 %vm48_vm0, %v44_v6  ;;  %v27_v23 = vld [vmem:[%s1896_s3 + $0x18] sm:$0xff] }
   0xf   :  { %1187 = vmatpush.xpose.msk.msra.mxu1 %vm114_vm1, %v32_v7 }
  0x12   :  { %1176 = vmatpush.xpose.msk.msra.mxu0 %vm48_vm0, %v43_v8 }
  0x13   :  { %1188 = vmatpush.xpose.msk.msra.mxu1 %vm114_vm1, %v31_v9 }
  0x16   :  { %1177 = vmatpush.xpose.msk.msra.mxu0 %vm48_vm0, %v42_v10 }
  0x17   :  { %1189 = vmatpush.xpose.msk.msra.mxu1 %vm114_vm1, %v30_v11 }
  0x1a   :  { %1178 = vmatpush.xpose.msk.msra.mxu0 %vm48_vm0, %v41_v12 }
  0x1b   :  { %1190 = vmatpush.xpose.msk.msra.mxu1 %vm114_vm1, %v29_v13  ;;  %v1298_v13 = vmov 2131351028  }
  0x1e   :  { %1179 = vmatpush.xpose.msk.msra.mxu0 %vm48_vm0, %v40_v14 }
  0x1f   :  { %1191 = vmatpush.xpose.msk.msra.mxu1 %vm114_vm1, %v28_v15 }
  0x21   :  { %1180 = vmatmul.msk.f32.vlgmr.msra.gmra.mxu0 %vm48_vm0, %v36_v16 }
  0x22   :  { %1192 = vmatmul.msk.f32.vlgmr.msra.gmra.mxu1 %vm114_vm1, %v24_v17 }
  0x29   :  { %1181 = vmatmul.msk.f32.gmra.mxu0 %vm48_vm0, %v37_v18 }
  0x2a   :  { %1193 = vmatmul.msk.f32.gmra.mxu1 %vm114_vm1, %v25_v19 }
  0x31   :  { %1182 = vmatmul.msk.f32.gmra.mxu0 %vm48_vm0, %v38_v20 }
  0x32   :  { %1194 = vmatmul.msk.f32.gmra.mxu1 %vm114_vm1, %v26_v21 }
  0x39   :  { %1183 = vmatmul.msk.f32.gmra.mxu0 %vm48_vm0, %v39_v22 }
  0x3a   :  { %1195 = vmatmul.msk.f32.gmra.mxu1 %vm114_vm1, %v27_v23 }
  0x9e   :  { %v102_v25 = vpop.f32.mrf.mxu0 }
  0x9f   :  { %v168_v26 = vpop.f32.mrf.mxu1 }
  0xa0   :  { %v1435_v27 = vadd.f32 %v168_v26, %v102_v25 }
  0xa2   :  { %v183_v28 = vand.u32 2139095040, %v1435_v27  ;;  %v180_v40 = vand.u32 2147483647, %v1435_v27 }
  0xa4   :  { %v184_v29 = vshrl.u32 %v183_v28, 23  ;;  %v1454_v47 = vand.u32 8388607, %v180_v40 }
  0xa6   :  { %v1196_v30 = vadd.s32 4294967169, %v184_v29  ;;  %v105_v31 = vpop.f32.mrf.mxu0  ;;  %v188_v55 = vor.u32 8388608, %v1454_v47 }
  0xa7   :  { %v171_v32 = vpop.f32.mrf.mxu1 }
  0xa8   :  { %v190_v33 = vadd.s32 1, %v1196_v30  ;;  %v1438_v34 = vadd.f32 %v171_v32, %v105_v31 }
  0xaa   :  { %vm191_vm2 = vcmp.gt.s32.totalorder %v190_v33, 0  ;;  %v335_v35 = vand.u32 2147483647, %v1438_v34  ;;  %v338_v36 = vand.u32 2139095040, %v1438_v34 }
  0xab   :  { %v192_v37 = vsel %vm191_vm2, %v190_v33, 0 }
  0xac   :  { %v1442_v38 = vand.u32 31, %v192_v37  ;;  %v339_v39 = vshrl.u32 %v338_v36, 23  ;;  %v342_v41 = vand.u32 8388607, %v335_v35  ;;  %v1460_v56 = vshrl.u32 %v192_v37, 5 }
  0xae   :  { %v1448_v42 = vsub.s32 32, %v1442_v38  ;;  %v1199_v43 = vadd.s32 4294967169, %v339_v39  ;;  %v108_v44 = vpop.f32.mrf.mxu0  ;;  %v343_v49 = vor.u32 8388608, %v342_v41  ;;  %v206_v58 = vshll.u32 %v1294_v57, %v1442_v38 }
  0xaf   :  { %v174_v45 = vpop.f32.mrf.mxu1  ;;  %v1466_v59 = vshll.u32 %v1293_v51, %v1442_v38  ;;  %v197_v1 = vshll.u32 %v1296_v0, %v1442_v38  ;;  %v200_v3 = vshll.u32 %v1297_v2, %v1442_v38  ;;  %vm215_vm4 = vcmp.lt.s32.totalorder %v1460_v56, 4 }
  0xb0   :  { %v1450_v46 = vadd.f32 %v174_v45, %v108_v44  ;;  %v345_v48 = vadd.s32 1, %v1199_v43  ;;  %v207_v52 = vshrl.u32 %v1293_v51, %v1448_v42  ;;  %v210_v62 = vshrl.u32 %v1295_v61, %v1448_v42 }
  0xb1   :  { %v1470_v63 = vshll.u32 %v343_v49, 8  ;;  %v198_v7 = vshrl.u32 %v1297_v2, %v1448_v42 }
  0xb2   :  { %v647_v50 = vand.u32 2139095040, %v1450_v46  ;;  %vm346_vm3 = vcmp.gt.s32.totalorder %v345_v48, 0  ;;  %v1476_v4 = vor.u32 %v207_v52, %v206_v58  ;;  %v644_v11 = vand.u32 2147483647, %v1450_v46 }
  0xb3   :  { %v347_v53 = vsel %vm346_vm3, %v345_v48, 0  ;;  %v211_v32 = vor.u32 %v210_v62, %v1466_v59  ;;  %v384_v52 = vand.u32 65535, %v1470_v63 }
  0xb4   :  { %v648_v54 = vshrl.u32 %v647_v50, 23  ;;  %v349_v60 = vand.u32 31, %v347_v53  ;;  %v1480_v8 = vshrl.u32 %v347_v53, 5  ;;  %v651_v49 = vand.u32 8388607, %v644_v11 }
  0xb5   :  { %v201_v50 = vshrl.u32 %v1298_v13, %v1448_v42  ;;  %v1526_v53 = vshrl.u32 %v1470_v63, 16 }
  0xb6   :  { %v350_v5 = vsub.s32 32, %v349_v60  ;;  %v1205_v6 = vadd.s32 4294967169, %v648_v54  ;;  %v352_v9 = vshll.u32 %v1296_v0, %v349_v60  ;;  %v355_v10 = vshll.u32 %v1297_v2, %v349_v60  ;;  %v111_v17 = vpop.f32.mrf.mxu0 }
  0xb7   :  { %v358_v15 = vshll.u32 %v1298_v13, %v349_v60  ;;  %v177_v18 = vpop.f32.mrf.mxu1  ;;  %v361_v19 = vshll.u32 %v1294_v57, %v349_v60  ;;  %v364_v21 = vshll.u32 %v1293_v51, %v349_v60  ;;  %vm367_vm5 = vcmp.lt.s32.totalorder %v1480_v8, 1 }
  0xb8   :  { %v353_v12 = vshrl.u32 %v1297_v2, %v350_v5  ;;  %v356_v14 = vshrl.u32 %v1298_v13, %v350_v5  ;;  %v359_v16 = vshrl.u32 %v1294_v57, %v350_v5  ;;  %v362_v20 = vshrl.u32 %v1293_v51, %v350_v5 }
  0xb9   :  { %v365_v22 = vshrl.u32 %v1295_v61, %v350_v5  ;;  %v654_v28 = vadd.s32 1, %v1205_v6  ;;  %v1495_v31 = vadd.f32 %v177_v18, %v111_v17  ;;  %vm370_vm6 = vcmp.lt.s32.totalorder %v1480_v8, 4 }
  0xba   :  { %v354_v23 = vor.u32 %v353_v12, %v352_v9  ;;  %v357_v25 = vor.u32 %v356_v14, %v355_v10  ;;  %v360_v26 = vor.u32 %v359_v16, %v358_v15  ;;  %v363_v29 = vor.u32 %v362_v20, %v361_v19 }
  0xbb   :  { %v366_v30 = vor.u32 %v365_v22, %v364_v21  ;;  %vm369_vm7 = vcmp.lt.s32.totalorder %v1480_v8, 3  ;;  %vm655_vm8 = vcmp.gt.s32.totalorder %v654_v28, 0  ;;  %855 = vmatpush.msra.mxu2 %v1495_v31  ;;  %vm368_vm9 = vcmp.lt.s32.totalorder %v1480_v8, 2 }
  0xbc   :  { %v375_v33 = vsel %vm367_vm5, %v354_v23, %v357_v25  ;;  %v379_v36 = vsel %vm367_vm5, %v357_v25, %v360_v26  ;;  %v376_v37 = vsel %vm370_vm6, %v363_v29, 920167782  ;;  %v656_v44 = vsel %vm655_vm8, %v654_v28, 0 }
  0xbd   :  { %v380_v39 = vsel %vm370_vm6, %v366_v30, 1326507024  ;;  %v377_v41 = vsel %vm369_vm7, %v360_v26, %v376_v37  ;;  %v1528_v58 = vshrl.u32 %v656_v44, 5  ;;  %v351_v59 = vshrl.u32 %v1296_v0, %v350_v5 }
  0xbe   :  { %v381_v43 = vsel %vm369_vm7, %v363_v29, %v380_v39  ;;  %v1516_v45 = vsel %vm368_vm9, %v375_v33, %v377_v41  ;;  %v372_v60 = vsel %vm370_vm6, %v360_v26, 2102212464  ;;  %v658_v6 = vand.u32 31, %v656_v44 }
  0xbf   :  { %v382_v48 = vsel %vm368_vm9, %v379_v36, %v381_v43  ;;  %v1536_v9 = vsel %vm215_vm4, %v1476_v4, 920167782  ;;  %v1540_v10 = vsel %vm215_vm4, %v211_v32, 1326507024  ;;  %v408_v14 = vand.u32 65535, %v1516_v45 }
  0xc0   :  { %v387_v54 = vshrl.u32 %v382_v48, 16  ;;  %v386_v62 = vand.u32 65535, %v382_v48  ;;  %v1547_v5 = vsel %vm367_vm5, %v351_v59, %v354_v23  ;;  %v652_v15 = vor.u32 8388608, %v651_v49 }
  0xc1   :  { %v1549_v16 = vor.u32 %v198_v7, %v197_v1  ;;  %v1551_v17 = vor.u32 %v201_v50, %v200_v3  ;;  %v1555_v18 = vsel %vm369_vm7, %v357_v25, %v372_v60  ;;  %v409_v19 = vshrl.u32 %v1516_v45, 16 }
  0xc2   :  { %v1542_v12 = vmul.u32 %v387_v54, %v384_v52  ;;  %v659_v20 = vsub.s32 32, %v658_v6  ;;  %vm676_vm10 = vcmp.lt.s32.totalorder %v1528_v58, 1  ;;  %v388_v21 = vmul.u32 %v386_v62, %v384_v52 }
  0xc3   :  { %v1560_v22 = vmul.u32 %v386_v62, %v1526_v53  ;;  %vm677_vm11 = vcmp.lt.s32.totalorder %v1528_v58, 2  ;;  %v391_v1 = vmul.u32 %v387_v54, %v1526_v53  ;;  %v1565_v3 = vmul.u32 %v408_v14, %v384_v52 }
  0xc4   :  { %v392_v23 = vshll.u32 %v1542_v12, 16  ;;  %v661_v7 = vshll.u32 %v1296_v0, %v658_v6  ;;  %v664_v25 = vshll.u32 %v1297_v2, %v658_v6  ;;  %v662_v26 = vshrl.u32 %v1297_v2, %v659_v20 }
  0xc5   :  { %v665_v28 = vshrl.u32 %v1298_v13, %v659_v20  ;;  %v667_v29 = vshll.u32 %v1298_v13, %v658_v6  ;;  %v668_v30 = vshrl.u32 %v1294_v57, %v659_v20  ;;  %v1573_v32 = vmul.u32 %v409_v19, %v384_v52 }
  0xc6   :  { %v1576_v33 = vmul.u32 %v408_v14, %v1526_v53  ;;  %v670_v36 = vshll.u32 %v1294_v57, %v658_v6  ;;  %v671_v37 = vshrl.u32 %v1293_v51, %v659_v20  ;;  %vm1580_vm12 = vc.u32 %v388_v21, %v392_v23 }
  0xc7   :  { %v663_v2 = vor.u32 %v662_v26, %v661_v7  ;;  %v666_v41 = vor.u32 %v665_v28, %v664_v25  ;;  %v669_v43 = vor.u32 %v668_v30, %v667_v29  ;;  %v398_v44 = vadd.s32 %v392_v23, %v388_v21 }
  0xc8   :  { %v672_v45 = vor.u32 %v671_v37, %v670_v36  ;;  %v673_v48 = vshll.u32 %v1293_v51, %v658_v6  ;;  %v674_v49 = vshrl.u32 %v1295_v61, %v659_v20  ;;  %v660_v50 = vshrl.u32 %v1296_v0, %v659_v20 }
  0xc9   :  { %vm678_vm13 = vcmp.lt.s32.totalorder %v1528_v58, 3  ;;  %vm679_vm14 = vcmp.lt.s32.totalorder %v1528_v58, 4  ;;  %v684_v52 = vsel %vm676_vm10, %v663_v2, %v666_v41  ;;  %v1591_v62 = vshll.u32 %v652_v15, 8 }
  0xca   :  { %v675_v54 = vor.u32 %v674_v49, %v673_v48  ;;  %v681_v59 = vsel %vm679_vm14, %v669_v43, 2102212464  ;;  %v685_v60 = vsel %vm679_vm14, %v672_v45, 920167782  ;;  %v394_v14 = vshll.u32 %v1560_v22, 16 }
  0xcb   :  { %v397_v51 = vsel %vm1580_vm12, 1, %v1292_v24  ;;  %v686_v61 = vsel %vm678_vm13, %v669_v43, %v685_v60  ;;  %v688_v6 = vsel %vm676_vm10, %v666_v41, %v669_v43  ;;  %v680_v20 = vsel %vm676_vm10, %v660_v50, %v663_v2 }
  0xcc   :  { %v682_v21 = vsel %vm678_vm13, %v666_v41, %v681_v59  ;;  %v687_v23 = vsel %vm677_vm11, %v684_v52, %v686_v61  ;;  %v689_v7 = vsel %vm679_vm14, %v675_v54, 1326507024  ;;  %v693_v25 = vand.u32 65535, %v1591_v62 }
  0xcd   :  { %v690_v15 = vsel %vm678_vm13, %v672_v45, %v689_v7  ;;  %v717_v26 = vand.u32 65535, %v687_v23  ;;  %v718_v28 = vshrl.u32 %v687_v23, 16  ;;  %v413_v29 = vmul.u32 %v409_v19, %v1526_v53 }
  0xce   :  { %v691_v30 = vsel %vm677_vm11, %v688_v6, %v690_v15  ;;  %v694_v36 = vshrl.u32 %v1591_v62, 16  ;;  %vm400_vm15 = vc.u32 %v398_v44, %v394_v14  ;;  %v399_v37 = vadd.s32 %v397_v51, %v391_v1 }
  0xcf   :  { %v695_v39 = vand.u32 65535, %v691_v30  ;;  %v696_v2 = vshrl.u32 %v691_v30, 16  ;;  %v720_v41 = vmul.u32 %v718_v28, %v693_v25  ;;  %v1610_v43 = vsel %vm677_vm11, %v680_v20, %v682_v21 }
  0xd0   :  { %v721_v45 = vmul.u32 %v717_v26, %v694_v36  ;;  %v393_v48 = vshrl.u32 %v1542_v12, 16  ;;  %v395_v49 = vshrl.u32 %v1560_v22, 16  ;;  %v401_v50 = vsel %vm400_vm15, 1, %v1292_v24 }
  0xd1   :  { %v698_v53 = vmul.u32 %v696_v2, %v693_v25  ;;  %v699_v19 = vmul.u32 %v695_v39, %v694_v36  ;;  %v414_v52 = vshll.u32 %v1573_v32, 16  ;;  %v697_v44 = vmul.u32 %v695_v39, %v693_v25 }
  0xd2   :  { %v719_v1 = vmul.u32 %v717_v26, %v693_v25  ;;  %v722_v54 = vmul.u32 %v718_v28, %v694_v36  ;;  %v723_v59 = vshll.u32 %v720_v41, 16  ;;  %v700_v60 = vmul.u32 %v696_v2, %v694_v36 }
  0xd3   :  { %v701_v14 = vshll.u32 %v698_v53, 16  ;;  %v724_v58 = vshrl.u32 %v720_v41, 16  ;;  %v725_v51 = vshll.u32 %v721_v45, 16  ;;  %v726_v61 = vshrl.u32 %v721_v45, 16 }
  0xd4   :  { %vm727_vm0 = vc.u32 %v719_v1, %v723_v59  ;;  %v729_v6 = vadd.s32 %v723_v59, %v719_v1  ;;  %v403_v12 = vadd.s32 %v401_v50, %v399_v37  ;;  %v703_v20 = vshll.u32 %v699_v19, 16 }
  0xd5   :  { %vm705_vm1 = vc.u32 %v697_v44, %v701_v14  ;;  %v707_v22 = vadd.s32 %v701_v14, %v697_v44  ;;  %v728_v21 = vsel %vm727_vm0, 1, %v1292_v24  ;;  %v416_v15 = vshll.u32 %v1576_v33, 16 }
  0xd6   :  { %v706_v23 = vsel %vm705_vm1, 1, %v1292_v24  ;;  %v730_v7 = vadd.s32 %v728_v21, %v722_v54  ;;  %vm731_vm2 = vc.u32 %v729_v6, %v725_v51  ;;  %v404_v28 = vadd.s32 %v403_v12, %v393_v48 }
  0xd7   :  { %v708_v25 = vadd.s32 %v706_v23, %v700_v60  ;;  %vm709_vm3 = vc.u32 %v707_v22, %v703_v20  ;;  %v732_v26 = vsel %vm731_vm2, 1, %v1292_v24  ;;  %vm418_vm5 = vc.u32 %v1565_v3, %v414_v52 }
  0xd8   :  { %v710_v30 = vsel %vm709_vm3, 1, %v1292_v24  ;;  %v734_v36 = vadd.s32 %v732_v26, %v730_v7  ;;  %v420_v37 = vadd.s32 %v414_v52, %v1565_v3  ;;  %v702_v39 = vshrl.u32 %v698_v53, 16 }
  0xd9   :  { %v704_v2 = vshrl.u32 %v699_v19, 16  ;;  %v712_v41 = vadd.s32 %v710_v30, %v708_v25  ;;  %v419_v45 = vsel %vm418_vm5, 1, %v1292_v24  ;;  %v1624_v44 = vadd.s32 %v404_v28, %v395_v49 }
  0xda   :  { %v735_v50 = vadd.s32 %v734_v36, %v724_v58  ;;  %v421_v1 = vadd.s32 %v419_v45, %v413_v29  ;;  %vm422_vm6 = vc.u32 %v420_v37, %v416_v15  ;;  %v203_v59 = vshll.u32 %v1298_v13, %v1442_v38 }
  0xdb   :  { %v713_v54 = vadd.s32 %v712_v41, %v702_v39  ;;  %v423_v48 = vsel %vm422_vm6, 1, %v1292_v24  ;;  %v204_v60 = vshrl.u32 %v1294_v57, %v1448_v42  ;;  %v374_v3 = vsel %vm368_vm9, %v1547_v5, %v1555_v18 }
  0xdc   :  { %v736_v53 = vadd.s32 %v735_v50, %v726_v61  ;;  %v415_v49 = vshrl.u32 %v1573_v32, 16  ;;  %v425_v19 = vadd.s32 %v423_v48, %v421_v1  ;;  %v1638_v52 = vadd.s32 %v729_v6, %v725_v51 }
  0xdd   :  { %v1636_v29 = vadd.s32 %v713_v54, %v704_v2  ;;  %v1640_v14 = vadd.s32 %v420_v37, %v416_v15  ;;  %v1642_v58 = vor.u32 %v204_v60, %v203_v59  ;;  %v737_v38 = vmul.u32 %v1591_v62, %v1610_v43 }
  0xde   :  { %v740_v57 = vadd.s32 1, %v736_v53  ;;  %v417_v13 = vshrl.u32 %v1576_v33, 16  ;;  %v426_v8 = vadd.s32 %v425_v19, %v415_v49  ;;  %vm212_vm9 = vcmp.lt.s32.totalorder %v1460_v56, 1 }
  0xdf   :  { %vm739_vm7 = vc.u32 %v1636_v29, %v1638_v52  ;;  %vm430_vm8 = vc.u32 %v1624_v44, %v1640_v14  ;;  %vm214_vm10 = vcmp.lt.s32.totalorder %v1460_v56, 3  ;;  %v220_v32 = vsel %vm212_vm9, %v1549_v16, %v1551_v17 }
  0xe0   :  { %v741_v5 = vsel %vm739_vm7, %v740_v57, %v736_v53  ;;  %v427_v18 = vadd.s32 %v426_v8, %v417_v13  ;;  %v222_v33 = vsel %vm214_vm10, %v1642_v58, %v1536_v9  ;;  %vm213_vm11 = vcmp.lt.s32.totalorder %v1460_v56, 2 }
  0xe1   :  { %v742_v62 = vadd.s32 %v741_v5, %v737_v38  ;;  %v224_v43 = vsel %vm212_vm9, %v1551_v17, %v1642_v58  ;;  %v226_v51 = vsel %vm214_vm10, %v1476_v4, %v1540_v10  ;;  %v1674_v9 = vshll.u32 %v188_v55, 8 }
  0xe2   :  { %v431_v61 = vadd.s32 1, %v427_v18  ;;  %v227_v6 = vsel %vm213_vm11, %v224_v43, %v226_v51  ;;  %v428_v12 = vmul.u32 %v1470_v63, %v374_v3  ;;  %v223_v22 = vsel %vm213_vm11, %v220_v32, %v222_v33 }
  0xe3   :  { %v743_v20 = vadd.s32 536870912, %v742_v62  ;;  %v232_v21 = vshrl.u32 %v227_v6, 16  ;;  %v229_v4 = vand.u32 65535, %v1674_v9  ;;  %v231_v10 = vand.u32 65535, %v227_v6 }
  0xe4   :  { %v432_v23 = vsel %vm430_vm8, %v431_v61, %v427_v18  ;;  %v254_v55 = vshrl.u32 %v223_v22, 16  ;;  %v230_v26 = vshrl.u32 %v1674_v9, 16  ;;  %v253_v48 = vand.u32 65535, %v223_v22 }
  0xe5   :  { %v1683_v7 = vshrl.u32 %v743_v20, 30  ;;  %v433_v15 = vadd.s32 %v432_v23, %v428_v12  ;;  %v234_v47 = vmul.u32 %v232_v21, %v229_v4  ;;  %v233_v28 = vmul.u32 %v231_v10, %v229_v4 }
  0xe6   :  { %v1689_v39 = vmul.u32 %v231_v10, %v230_v26  ;;  %v1691_v2 = vmul.u32 %v254_v55, %v229_v4  ;;  %v236_v53 = vmul.u32 %v232_v21, %v230_v26  ;;  %v255_v13 = vmul.u32 %v253_v48, %v229_v4 }
  0xe7   :  { %v745_v25 = vshll.u32 %v1683_v7, 30  ;;  %v434_v63 = vadd.s32 536870912, %v433_v15  ;;  %v237_v30 = vshll.u32 %v234_v47, 16  ;;  %v257_v33 = vmul.u32 %v253_v48, %v230_v26 }
  0xe8   :  { %v239_v54 = vshll.u32 %v1689_v39, 16  ;;  %v259_v49 = vshll.u32 %v1691_v2, 16  ;;  %v196_v61 = vshrl.u32 %v1296_v0, %v1448_v42  ;;  %v429_v6 = vadd.s32 %v1640_v14, %v1624_v44 }
  0xe9   :  { %v746_v36 = vsub.s32 %v742_v62, %v745_v25  ;;  %v1687_v37 = vshrl.u32 %v434_v63, 30  ;;  %vm241_vm12 = vc.u32 %v233_v28, %v237_v30  ;;  %v243_v50 = vadd.s32 %v237_v30, %v233_v28 }
  0xea   :  { %v242_v3 = vsel %vm241_vm12, 1, %v1292_v24  ;;  %vm263_vm1 = vc.u32 %v255_v13, %v259_v49  ;;  %v738_v62 = vadd.s32 %v1638_v52, %v1636_v29  ;;  %v258_v22 = vmul.u32 %v254_v55, %v230_v26 }
  0xeb   :  { %vm747_vm13 = vcmp.lt.s32.totalorder %v746_v36, 0  ;;  %v748_v41 = vsub.s32 0, %v746_v36  ;;  %v436_v45 = vshll.u32 %v1687_v37, 30  ;;  %vm245_vm14 = vc.u32 %v243_v50, %v239_v54 }
  0xec   :  { %v244_v57 = vadd.s32 %v242_v3, %v236_v53  ;;  %v246_v5 = vsel %vm245_vm14, 1, %v1292_v24  ;;  %v264_v10 = vsel %vm263_vm1, 1, %v1292_v24  ;;  %v261_v25 = vshll.u32 %v257_v33, 16 }
  0xed   :  { %v749_v1 = vsel %vm747_vm13, %v748_v41, %v746_v36  ;;  %v437_v60 = vsub.s32 %v433_v15, %v436_v45  ;;  %v238_v15 = vshrl.u32 %v234_v47, 16  ;;  %v265_v29 = vadd.s32 %v259_v49, %v255_v13 }
  0xee   :  { %v750_v59 = vclz %v749_v1  ;;  %v248_v20 = vadd.s32 %v246_v5, %v244_v57  ;;  %v266_v30 = vadd.s32 %v264_v10, %v258_v22  ;;  %v216_v44 = vsel %vm212_vm9, %v196_v61, %v1549_v16 }
  0xef   :  { %vm438_vm15 = vcmp.lt.s32.totalorder %v437_v60, 0  ;;  %v439_v38 = vsub.s32 0, %v437_v60  ;;  %v217_v26 = vsel %vm215_vm4, %v1642_v58, 2102212464  ;;  %v240_v47 = vshrl.u32 %v1689_v39, 16 }
  0xf0   :  { %v1206_v19 = vadd.s32 4294967294, %v750_v59  ;;  %v249_v14 = vadd.s32 %v248_v20, %v238_v15  ;;  %vm267_vm3 = vc.u32 %v265_v29, %v261_v25  ;;  %v260_v48 = vshrl.u32 %v1691_v2, 16 }
  0xf1   :  { %v440_v8 = vsel %vm438_vm15, %v439_v38, %v437_v60  ;;  %v268_v50 = vsel %vm267_vm3, 1, %v1292_v24  ;;  %v218_v53 = vsel %vm214_vm10, %v1551_v17, %v217_v26  ;;  %v262_v49 = vshrl.u32 %v257_v33, 16 }
  0xf2   :  { %vm1207_vm0 = vcmp.lt.s32.totalorder %v1206_v19, 0  ;;  %v441_v32 = vclz %v440_v8  ;;  %v270_v59 = vadd.s32 %v268_v50, %v266_v30  ;;  %v1717_v58 = vadd.s32 %v249_v14, %v240_v47 }
  0xf3   :  { %v753_v18 = vsel %vm1207_vm0, 0, %v1206_v19  ;;  %v1719_v38 = vadd.s32 %v265_v29, %v261_v25  ;;  %v219_v57 = vsel %vm213_vm11, %v216_v44, %v218_v53  ;;  %vm646_vm4 = vcmp.lt.s32.totalorder %v1450_v46, 0 }
  0xf4   :  { %v754_v43 = vsub.s32 32, %v753_v18  ;;  %v758_v51 = vsub.s32 4294967266, %v753_v18  ;;  %v1200_v12 = vadd.s32 4294967294, %v441_v32  ;;  %v755_v21 = vshll.u32 %v746_v36, %v753_v18 }
  0xf5   :  { %vm275_vm5 = vc.u32 %v1717_v58, %v1719_v38  ;;  %vm1728_vm6 = vcmp.le.f32.partialorder %v644_v11, 0.7853982  ;;  %v459_v33 = vsub.s32 4, %v1687_v37  ;;  %vm337_vm7 = vcmp.lt.s32.totalorder %v1438_v34, 0 }
  0xf6   :  { %v756_v23 = vshrl.u32 %v738_v62, %v754_v43  ;;  %v759_v4 = vadd.s32 127, %v758_v51  ;;  %vm1201_vm2 = vcmp.lt.s32.totalorder %v1200_v12, 0  ;;  %v273_v62 = vmul.u32 %v1674_v9, %v219_v57 }
  0xf7   :  { %v444_v28 = vsel %vm1201_vm2, 0, %v1200_v12  ;;  %v768_v43 = vsub.s32 4, %v1683_v7  ;;  %vm336_vm8 = vcmp.le.f32.partialorder %v335_v35, 0.7853982  ;;  %vm787_vm10 = vweird.f32 %v1450_v46 }
  0xf8   :  { %v757_v52 = vor.u32 %v756_v23, %v755_v21  ;;  %v760_v63 = vshll.u32 %v759_v4, 23  ;;  %v445_v42 = vsub.s32 32, %v444_v28  ;;  %v449_v0 = vsub.s32 4294967266, %v444_v28 }
  0xf9   :  { %v446_v36 = vshll.u32 %v437_v60, %v444_v28  ;;  %v271_v60 = vadd.s32 %v270_v59, %v260_v48  ;;  %v460_v21 = vsel %vm337_vm7, %v459_v33, %v1687_v37  ;;  %v769_v9 = vsel %vm646_vm4, %v768_v43, %v1683_v7 }
  0xfa   :  { %v761_v55 = vor.u32 4788187, %v760_v63  ;;  %v447_v41 = vshrl.u32 %v429_v6, %v445_v42  ;;  %v450_v45 = vadd.s32 127, %v449_v0  ;;  %v764_v54 = vcvt.s32.f32 %v757_v52 }
  0xfb   :  { %v272_v2 = vadd.s32 %v271_v60, %v262_v49  ;;  %v462_v28 = vsel %vm336_vm8, 0, %v460_v21  ;;  %v771_v35 = vsel %vm1728_vm6, 0, %v769_v9  ;;  %vm478_vm14 = vweird.f32 %v1438_v34 }
  0xfc   :  { %v762_v1 = vand.u32 2147483647, %v761_v55  ;;  %v448_v16 = vor.u32 %v447_v41, %v446_v36  ;;  %v451_v3 = vshll.u32 %v450_v45, 23  ;;  %v479_v55 = vadd.s32 3, %v462_v28 }
  0xfd   :  { %v276_v18 = vadd.s32 1, %v272_v2  ;;  %v788_v41 = vand.u32 3, %v771_v35  ;;  %v634_v59 = vand.u32 3, %v462_v28  ;;  %vm800_vm3 = vcmask 1043456   ;;  %v809_v35 = vld [vmem:[%s1898_s5 + $0x18] sm:$0xff] }
  0xfe   :  { %v765_v39 = vmul.f32 %v764_v54, %v762_v1  ;;  %v452_v19 = vor.u32 4788187, %v451_v3  ;;  %v455_v8 = vcvt.s32.f32 %v448_v16  ;;  %v480_v53 = vand.u32 3, %v479_v55  ;;  %827 = vperm.xlu0 %1257, %v809_v35   ;;  %v1218_v35 = vld [vmem:[%s1898_s5 + $0x30] sm:$0xff] }
  0xff   :  { %v277_v11 = vsel %vm275_vm5, %v276_v18, %v272_v2  ;;  %vm789_vm11 = vcmp.lt.s32.totalorder %v788_v41, 2  ;;  %vm790_vm12 = vcmp.eq.s32.totalorder %v788_v41, 0  ;;  %vm793_vm13 = vcmp.eq.s32.totalorder %v788_v41, 2 }
 0x100   :  { %v766_v24 = vxor.u32 2147483648, %v765_v39  ;;  %v453_v13 = vand.u32 2147483647, %v452_v19  ;;  %v278_v6 = vadd.s32 %v277_v11, %v273_v62  ;;  %vm635_vm15 = vcmp.lt.s32.totalorder %v634_v59, 2 }
 0x101   :  { %vm636_vm0 = vcmp.eq.s32.totalorder %v634_v59, 0  ;;  %vm481_vm1 = vcmp.lt.s32.totalorder %v480_v53, 2  ;;  %vm482_vm2 = vcmp.eq.s32.totalorder %v480_v53, 0  ;;  %vm485_vm5 = vcmp.eq.s32.totalorder %v480_v53, 2 }
 0x102   :  { %v767_v5 = vsel %vm646_vm4, %v766_v24, %v765_v39  ;;  %v456_v32 = vmul.f32 %v455_v8, %v453_v13  ;;  %v279_v23 = vadd.s32 536870912, %v278_v6 }
 0x103   :  { %v770_v56 = vsel %vm1728_vm6, %v1450_v46, %v767_v5  ;;  %vm639_vm6 = vcmp.eq.s32.totalorder %v634_v59, 2  ;;  %v806_v59 = vld [vmem:[%s1898_s5] sm:$0xff] }
 0x104   :  { %v772_v51 = vmul.f32 %v770_v56, %v770_v56  ;;  %v457_v61 = vxor.u32 2147483648, %v456_v32  ;;  %v1748_v29 = vshrl.u32 %v279_v23, 30 }
 0x106   :  { %v773_v12 = vmul.f32 -0.001358992, %v772_v51  ;;  %v780_v20 = vmul.f32 -0.00019511016, %v772_v51  ;;  %v458_v22 = vsel %vm337_vm7, %v457_v61, %v456_v32  ;;  %v281_v42 = vshll.u32 %v1748_v29, 30 }
 0x107   :  { %v461_v15 = vsel %vm336_vm8, %v1438_v34, %v458_v22  ;;  %vm798_vm7 = vcmask 1041408   ;;  %vm182_vm8 = vcmp.lt.s32.totalorder %v1435_v27, 0  ;;  %v304_v55 = vsub.s32 4, %v1748_v29 }
 0x108   :  { %v774_v4 = vadd.f32 0.041655596, %v773_v12  ;;  %v781_v10 = vadd.f32 0.008332121, %v780_v20  ;;  %v463_v25 = vmul.f32 %v461_v15, %v461_v15  ;;  %v282_v26 = vsub.s32 %v278_v6, %v281_v42 }
 0x109   :  { %v305_v41 = vsel %vm182_vm8, %v304_v55, %v1748_v29 }
 0x10a   :  { %v775_v52 = vmul.f32 %v774_v4, %v772_v51  ;;  %v782_v63 = vmul.f32 %v781_v10, %v772_v51  ;;  %v464_v30 = vmul.f32 -0.001358992, %v463_v25  ;;  %v471_v37 = vmul.f32 -0.00019511016, %v463_v25 }
 0x10b   :  { %vm283_vm9 = vcmp.lt.s32.totalorder %v282_v26, 0  ;;  %v284_v1 = vsub.s32 0, %v282_v26 }
 0x10c   :  { %v776_v0 = vadd.f32 -0.4999988, %v775_v52  ;;  %v783_v44 = vadd.f32 -0.16666654, %v782_v63  ;;  %v465_v7 = vadd.f32 0.041655596, %v464_v30 }
 0x10d   :  { %v472_v14 = vadd.f32 0.008332121, %v471_v37  ;;  %v285_v39 = vsel %vm283_vm9, %v284_v1, %v282_v26  ;;  %vm1775_vm9 = vcmp.le.f32.partialorder %v180_v40, 0.7853982 }
 0x10e   :  { %v777_v47 = vmul.f32 %v776_v0, %v772_v51  ;;  %v784_v36 = vmul.f32 %v783_v44, %v772_v51  ;;  %v466_v45 = vmul.f32 %v465_v7, %v463_v25  ;;  %v286_v19 = vclz %v285_v39  ;;  %v807_v7 = vld [vmem:[%s1898_s5 + $0x8] sm:$0xff]  ;;  %v1215_v44 = vld [vmem:[%s1897_s4 + $0x38] sm:$0xff] }
 0x10f   :  { %v473_v50 = vmul.f32 %v472_v14, %v463_v25  ;;  %v274_v51 = vadd.s32 %v1719_v38, %v1717_v58  ;;  %v808_v14 = vld [vmem:[%s1898_s5 + $0x10] sm:$0xff]  ;;  %817 = vperm.xlu1 %1258, %v807_v7   ;;  %v307_v1 = vsel %vm1775_vm9, 0, %v305_v41 }
 0x110   :  { %v778_v54 = vadd.f32 1.0, %v777_v47  ;;  %v785_v48 = vadd.f32 1.0, %v784_v36  ;;  %v467_v16 = vadd.f32 -0.4999988, %v466_v45  ;;  %v1197_v13 = vadd.s32 4294967294, %v286_v19  ;;  %822 = vperm.xlu0 %1257, %v808_v14  }
 0x111   :  { %v474_v3 = vadd.f32 -0.16666654, %v473_v50  ;;  %v324_v29 = vadd.s32 3, %v307_v1 }
 0x112   :  { %v786_v49 = vmul.f32 %v785_v48, %v770_v56  ;;  %v794_v60 = vxor.u32 2147483648, %v778_v54  ;;  %v468_v24 = vmul.f32 %v467_v16, %v463_v25  ;;  %vm1198_vm4 = vcmp.lt.s32.totalorder %v1197_v13, 0  ;;  %v1217_v16 = vld [vmem:[%s1898_s5 + $0x28] sm:$0xff] }
 0x113   :  { %v475_v57 = vmul.f32 %v474_v3, %v463_v25  ;;  %v289_v62 = vsel %vm1198_vm4, 0, %v1197_v13  ;;  %v1230_v13 = vld [vmem:[%s1898_s5 + $0x50] sm:$0xff]  ;;  %vm1154_vm4 = vcmask 519171  }
 0x114   :  { %v791_v2 = vxor.u32 2147483648, %v786_v49  ;;  %v469_v8 = vadd.f32 1.0, %v468_v24  ;;  %v795_v18 = vsel %vm793_vm13, %v794_v60, %v786_v49  ;;  %v290_v11 = vsub.s32 32, %v289_v62 }
 0x115   :  { %v476_v17 = vadd.f32 1.0, %v475_v57  ;;  %v294_v61 = vsub.s32 4294967266, %v289_v62  ;;  %v291_v20 = vshll.u32 %v282_v26, %v289_v62  ;;  %v325_v24 = vand.u32 3, %v324_v29  ;;  %v1240_v62 = vld [vmem:[%s1898_s5 + $0x60] sm:$0xff]  ;;  %v1226_v29 = vld [vmem:[%s1897_s4 + $0x50] sm:$0xff] }
 0x116   :  { %v792_v5 = vsel %vm790_vm12, %v778_v54, %v791_v2  ;;  %v486_v33 = vxor.u32 2147483648, %v469_v8  ;;  %v292_v22 = vshrl.u32 %v274_v51, %v290_v11  ;;  %vm323_vm13 = vweird.f32 %v1435_v27  ;;  %v804_v51 = vld [vmem:[%s1897_s4 + $0x10] sm:$0xff]  ;;  %v805_v11 = vld [vmem:[%s1897_s4 + $0x18] sm:$0xff] }
 0x117   :  { %v796_v56 = vsel %vm789_vm11, %v792_v5, %v795_v18  ;;  %v477_v32 = vmul.f32 %v476_v17, %v461_v15  ;;  %v295_v21 = vadd.s32 127, %v294_v61  ;;  %812 = vperm.xlu1 %1258, %v806_v59   ;;  %vm330_vm11 = vcmp.eq.s32.totalorder %v325_v24, 2 }
 0x118   :  { %v797_v43 = vsel %vm787_vm10, nan, %v796_v56  ;;  %v293_v15 = vor.u32 %v292_v22, %v291_v20  ;;  %893 = vperm.xlu0 %1257, %v1217_v16   ;;  %vm327_vm10 = vcmp.eq.s32.totalorder %v325_v24, 0  ;;  %vm326_vm12 = vcmp.lt.s32.totalorder %v325_v24, 2 }
 0x119   :  { %v801_v6 = vsel %vm800_vm3, %v797_v43, %v1450_v46  ;;  %v483_v12 = vxor.u32 2147483648, %v477_v32  ;;  %v487_v9 = vsel %vm485_vm5, %v486_v33, %v477_v32  ;;  %v641_v10 = vsel %vm639_vm6, %v486_v33, %v477_v32  ;;  %v802_v32 = vld [vmem:[%s1897_s4] sm:$0xff]  ;;  %v1229_v43 = vld [vmem:[%s1898_s5 + $0x48] sm:$0xff] }
 0x11a   :  { %856 = vmatpush.msra.mxu2 %v801_v6  ;;  %v296_v46 = vshll.u32 %v295_v21, 23  ;;  %v300_v37 = vcvt.s32.f32 %v293_v15  ;;  %v1219_v15 = vld [vmem:[%s1898_s5 + $0x38] sm:$0xff] }
 0x11b   :  { %v484_v23 = vsel %vm482_vm2, %v469_v8, %v483_v12  ;;  %v638_v4 = vsel %vm636_vm0, %v469_v8, %v483_v12  ;;  %v1216_v8 = vld [vmem:[%s1898_s5 + $0x20] sm:$0xff]  ;;  %903 = vperm.xlu2 %1259, %v1219_v15  }
 0x11c   :  { %v488_v58 = vsel %vm481_vm1, %v484_v23, %v487_v9  ;;  %v642_v38 = vsel %vm635_vm15, %v638_v4, %v641_v10  ;;  %v297_v28 = vor.u32 4788187, %v296_v46 }
 0x11d   :  { %v489_v25 = vsel %vm478_vm14, nan, %v488_v58  ;;  %v643_v52 = vsel %vm478_vm14, nan, %v642_v38  ;;  %vm830_vm14 = vcmask 261120  }
 0x11e   :  { %v799_v63 = vsel %vm798_vm7, %v489_v25, %v643_v52  ;;  %v298_v30 = vand.u32 2147483647, %v297_v28  ;;  %v1212_v28 = vld [vmem:[%s1897_s4 + $0x20] sm:$0xff] }
 0x11f   :  { %857 = vmatpush.msra.mxu2 %v799_v63  ;;  %888 = vperm.xlu1 %1258, %v1216_v8  }
 0x120   :  { %v301_v42 = vmul.f32 %v300_v37, %v298_v30  ;;  %973 = vperm.xlu0 %1257, %v1230_v13   ;;  %v1213_v30 = vld [vmem:[%s1897_s4 + $0x28] sm:$0xff]  ;;  %v1231_v37 = vld [vmem:[%s1898_s5 + $0x58] sm:$0xff] }
 0x122   :  { %v302_v0 = vxor.u32 2147483648, %v301_v42 }
 0x123   :  { %898 = vperm.xlu2 %1259, %v1218_v35  }
 0x124   :  { %v303_v34 = vsel %vm182_vm8, %v302_v0, %v301_v42  ;;  %v1214_v42 = vld [vmem:[%s1897_s4 + $0x30] sm:$0xff]  ;;  %v1228_v0 = vld [vmem:[%s1898_s5 + $0x40] sm:$0xff] }
 0x125   :  { %v306_v26 = vsel %vm1775_vm9, %v1435_v27, %v303_v34  ;;  %v803_v27 = vld [vmem:[%s1897_s4 + $0x8] sm:$0xff] }
 0x126   :  { %v308_v40 = vmul.f32 %v306_v26, %v306_v26 }
 0x127   :  { %968 = vperm.xlu1 %1258, %v1229_v43  }
 0x128   :  { %v309_v47 = vmul.f32 -0.001358992, %v308_v40  ;;  %v316_v36 = vmul.f32 -0.00019511016, %v308_v40  ;;  %1038 = vperm.xlu0 %1257, %v1240_v62  }
 0x12a   :  { %v310_v45 = vadd.f32 0.041655596, %v309_v47  ;;  %v317_v50 = vadd.f32 0.008332121, %v316_v36 }
 0x12b   :  { %978 = vperm.xlu2 %1259, %v1231_v37  }
 0x12c   :  { %v311_v54 = vmul.f32 %v310_v45, %v308_v40  ;;  %v318_v48 = vmul.f32 %v317_v50, %v308_v40 }
 0x12e   :  { %v312_v3 = vadd.f32 -0.4999988, %v311_v54  ;;  %v319_v53 = vadd.f32 -0.16666654, %v318_v48 }
 0x130   :  { %v313_v39 = vmul.f32 %v312_v3, %v308_v40  ;;  %v320_v49 = vmul.f32 %v319_v53, %v308_v40  ;;  %v1224_v3 = vld [vmem:[%s1897_s4 + $0x40] sm:$0xff]  ;;  %v1225_v53 = vld [vmem:[%s1897_s4 + $0x48] sm:$0xff] }
 0x132   :  { %v314_v60 = vadd.f32 1.0, %v313_v39  ;;  %v321_v19 = vadd.f32 1.0, %v320_v49  ;;  %v1227_v39 = vld [vmem:[%s1897_s4 + $0x58] sm:$0xff] }
 0x133   :  { %963 = vperm.xlu2 %1259, %v1228_v0  }
 0x134   :  { %v322_v57 = vmul.f32 %v321_v19, %v306_v26  ;;  %v331_v2 = vxor.u32 2147483648, %v314_v60 }
 0x136   :  { %v328_v17 = vxor.u32 2147483648, %v322_v57  ;;  %v332_v18 = vsel %vm330_vm11, %v331_v2, %v322_v57 }
 0x138   :  { %v329_v5 = vsel %vm327_vm10, %v314_v60, %v328_v17 }
 0x139   :  { %v333_v56 = vsel %vm326_vm12, %v329_v5, %v332_v18 }
 0x13a   :  { %v334_v33 = vsel %vm323_vm13, nan, %v333_v56 }
 0x13b   :  { %858 = vmatpush.msra.mxu2 %v334_v33 }
 0x13c   :  { %1208 = vmatmul.msk.f32.vlgmr.msra.gmra.mxu2 %vm830_vm14, %v802_v32 }
 0x144   :  { %1209 = vmatmul.msk.f32.gmra.mxu2 %vm830_vm14, %v803_v27  ;;  %v1236_v27 = vld [vmem:[%s1897_s4 + $0x60] sm:$0xff] }
 0x14c   :  { %1210 = vmatmul.msk.f32.gmra.mxu2 %vm830_vm14, %v804_v51  ;;  %v1237_v51 = vld [vmem:[%s1897_s4 + $0x68] sm:$0xff] }
 0x154   :  { %1211 = vmatmul.msk.f32.gmra.mxu2 %vm830_vm14, %v805_v11  ;;  %v1238_v11 = vld [vmem:[%s1897_s4 + $0x70] sm:$0xff] }
 0x170   :  { %v828_v12 = vpop.permute.xlu0 %827 }
 0x175   :  { %v904_v14 = vpop.permute.xlu2 %903 }
 0x17d   :  { %v899_v26 = vpop.permute.xlu2 %898 }
 0x181   :  { %v818_v20 = vpop.permute.xlu1 %817 }
 0x182   :  { %v823_v21 = vpop.permute.xlu0 %822 }
 0x185   :  { %v979_v24 = vpop.permute.xlu2 %978 }
 0x189   :  { %v813_v10 = vpop.permute.xlu1 %812 }
 0x18a   :  { %v894_v41 = vpop.permute.xlu0 %893 }
 0x18d   :  { %v964_v56 = vpop.permute.xlu2 %963 }
 0x191   :  { %v889_v1 = vpop.permute.xlu1 %888 }
 0x192   :  { %v974_v57 = vpop.permute.xlu0 %973 }
 0x199   :  { %v969_v17 = vpop.permute.xlu1 %968 }
 0x1bf   :  { %v860_v61 = vpop.f32.mrf.mxu2 }
 0x1c0   :  { %v861_v46 = vadd.f32 %v860_v61, %v813_v10  ;;  %v1239_v61 = vld [vmem:[%s1897_s4 + $0x78] sm:$0xff]  ;;  %s1300_s4 = smov [#allocation2]  }
 0x1c1   :  { %s1161_s3 = sshll.u32 %s1300_s4, 4  ;;  %s1162_s3 = int_to_ptr.vmem [resolvable:$true] %s1161_s3 }
 0x1c2   :  { %v872_v63 = vmax.f32 %v861_v46, 0.0 }
 0x1c7   :  { %v863_v6 = vpop.f32.mrf.mxu2 }
 0x1c8   :  { %v864_v58 = vadd.f32 %v863_v6, %v818_v20  ;;  %v1039_v6 = vpop.permute.xlu0 %1038 }
 0x1ca   :  { %v873_v52 = vmax.f32 %v864_v58, 0.0 }
 0x1cf   :  { %v866_v22 = vpop.f32.mrf.mxu2 }
 0x1d0   :  { %v867_v9 = vadd.f32 %v866_v22, %v823_v21 }
 0x1d2   :  { %v874_v25 = vmax.f32 %v867_v9, 0.0 }
 0x1d7   :  { %v869_v23 = vpop.f32.mrf.mxu2 }
 0x1d8   :  { %v870_v4 = vadd.f32 %v869_v23, %v828_v12 }
 0x1da   :  { %v875_v38 = vmax.f32 %v870_v4, 0.0 }
 0x1dc   :  { %930 = vmatpush.msra.mxu3 %v875_v38 }
 0x1de   :  { %931 = vmatpush.msra.mxu3 %v874_v25 }
 0x1e0   :  { %932 = vmatpush.msra.mxu3 %v873_v52 }
 0x1e2   :  { %933 = vmatpush.msra.mxu3 %v872_v63 }
 0x1e3   :  { %1220 = vmatmul.msk.f32.vlgmr.msra.gmra.mxu3 %vm830_vm14, %v1212_v28  ;;  %v1134_v28 = vmul.f32 %v1495_v31, %v1495_v31 }
 0x1e5   :  { %v1136_v37 = vrot.slane %v1134_v28, 1 }
 0x1eb   :  { %1221 = vmatmul.msk.f32.gmra.mxu3 %vm830_vm14, %v1213_v30 }
 0x1f3   :  { %1222 = vmatmul.msk.f32.gmra.mxu3 %vm830_vm14, %v1214_v42 }
 0x1fb   :  { %1223 = vmatmul.msk.f32.gmra.mxu3 %vm830_vm14, %v1215_v44 }
 0x266   :  { %v935_v34 = vpop.f32.mrf.mxu3 }
 0x267   :  { %v936_v54 = vadd.f32 %v935_v34, %v889_v1 }
 0x269   :  { %v947_v16 = vmax.f32 %v936_v54, 0.0 }
 0x26e   :  { %v938_v7 = vpop.f32.mrf.mxu3 }
 0x26f   :  { %v939_v45 = vadd.f32 %v938_v7, %v894_v41  ;;  %v1138_v7 = vadd.f32 %v1136_v37, %v1134_v28 }
 0x271   :  { %v948_v59 = vmax.f32 %v939_v45, 0.0  ;;  %vm1139_vm15 = vcmp.le.f32.partialorder %v1138_v7, 1.0 }
 0x276   :  { %v941_v55 = vpop.f32.mrf.mxu3 }
 0x277   :  { %v942_v47 = vadd.f32 %v941_v55, %v899_v26 }
 0x279   :  { %v949_v48 = vmax.f32 %v942_v47, 0.0  ;;  %v1299_v47 = vmov 0.0  }
 0x27e   :  { %v944_v40 = vpop.f32.mrf.mxu3 }
 0x27f   :  { %v945_v36 = vadd.f32 %v944_v40, %v904_v14 }
 0x281   :  { %v950_v50 = vmax.f32 %v945_v36, 0.0  ;;  %v1140_v36 = vsel %vm1139_vm15, 0.31830987, %v1299_v47 }
 0x283   :  { %1005 = vmatpush.msrb.mxu2 %v950_v50 }
 0x285   :  { %1006 = vmatpush.msrb.mxu2 %v949_v48 }
 0x287   :  { %1007 = vmatpush.msrb.mxu2 %v948_v59 }
 0x289   :  { %1008 = vmatpush.msrb.mxu2 %v947_v16 }
 0x28a   :  { %1232 = vmatmul.msk.f32.vlgmr.msrb.gmra.mxu2 %vm830_vm14, %v1224_v3 }
 0x292   :  { %1233 = vmatmul.msk.f32.gmra.mxu2 %vm830_vm14, %v1225_v53 }
 0x29a   :  { %1234 = vmatmul.msk.f32.gmra.mxu2 %vm830_vm14, %v1226_v29 }
 0x2a2   :  { %1235 = vmatmul.msk.f32.gmra.mxu2 %vm830_vm14, %v1227_v39 }
 0x30d   :  { %v1010_v49 = vpop.f32.mrf.mxu2 }
 0x30e   :  { %v1011_v32 = vadd.f32 %v1010_v49, %v964_v56 }
 0x310   :  { %v1022_v43 = vmax.f32 %v1011_v32, 0.0 }
 0x315   :  { %v1013_v60 = vpop.f32.mrf.mxu2 }
 0x316   :  { %v1014_v5 = vadd.f32 %v1013_v60, %v969_v17 }
 0x318   :  { %v1023_v62 = vmax.f32 %v1014_v5, 0.0 }
 0x31d   :  { %v1016_v19 = vpop.f32.mrf.mxu2 }
 0x31e   :  { %v1017_v13 = vadd.f32 %v1016_v19, %v974_v57 }
 0x320   :  { %v1024_v33 = vmax.f32 %v1017_v13, 0.0 }
 0x325   :  { %v1019_v2 = vpop.f32.mrf.mxu2 }
 0x326   :  { %v1020_v8 = vadd.f32 %v1019_v2, %v979_v24 }
 0x328   :  { %v1025_v18 = vmax.f32 %v1020_v8, 0.0 }
 0x32a   :  { %1077 = vmatpush.msrb.mxu3 %v1025_v18 }
 0x32c   :  { %1078 = vmatpush.msrb.mxu3 %v1024_v33 }
 0x32e   :  { %1079 = vmatpush.msrb.mxu3 %v1023_v62 }
 0x330   :  { %1080 = vmatpush.msrb.mxu3 %v1022_v43 }
 0x331   :  { %1244 = vmatmul.msk.f32.vlgmr.msrb.gmra.mxu3 %vm830_vm14, %v1236_v27 }
 0x339   :  { %1245 = vmatmul.msk.f32.gmra.mxu3 %vm830_vm14, %v1237_v51 }
 0x341   :  { %1246 = vmatmul.msk.f32.gmra.mxu3 %vm830_vm14, %v1238_v11 }
 0x349   :  { %1247 = vmatmul.msk.f32.gmra.mxu3 %vm830_vm14, %v1239_v61 }
 0x3b4   :  { %v1082_v12 = vpop.f32.mrf.mxu3 }
 0x3b5   :  { %v1083_v20 = vadd.f32 %v1082_v12, %v1039_v6 }
 0x3b7   :  { %v1091_v22 = vsub.f32 0.0, %v1083_v20  ;;  %v1094_v21 = vand.u32 2147483647, %v1083_v20  ;;  %v1115_v58 = vrot.slane %v1083_v20, 2 }
 0x3b9   :  { %v1092_v23 = vmul.f32 1.442695, %v1091_v22  ;;  %v1096_v9 = vrot.slane %v1094_v21, 1  ;;  %v1117_v46 = vsub.f32 %v1495_v31, %v1115_v58  ;;  %v1146_v31 = vrot.slane %v1140_v36, 2 }
 0x3bb   :  { %1260 = vpow2.f32 %v1092_v23  ;;  %v1098_v4 = vadd.f32 %v1096_v9, %v1094_v21  ;;  %v1148_v59 = vmul.f32 %v1146_v31, %v1094_v21 }
 0x3bc   :  { %v1085_v10 = vpop.f32.mrf.mxu3 }
 0x3bd   :  { %v1099_v38 = vmax.f32 %v1098_v4, 1e-12  ;;  %v1150_v49 = vrot.slane %v1148_v59, 1 }
 0x3bf   :  { %1262 = vrcp.f32 %v1099_v38  ;;  %v1111_v16 = vand.u32 2147483648, %v1099_v38  ;;  %vm1105_vm1 = vweird.f32 %v1099_v38  ;;  %v1109_v3 = vand.u32 2147483647, %v1099_v38 }
 0x3c1   :  { %v1261_v15 = vpop.eup %1260  ;;  %v1112_v60 = vor.u32 1.1754944e-38, %v1111_v16  ;;  %vm1110_vm3 = vcmp.eq.f32.partialorder %v1109_v3, 8.507059e+37 }
 0x3c2   :  { %v1118_v25 = vperm.slane %v1261_v15, 2  ;;  %v1128_v26 = vmul.f32 %v1261_v15, %v1261_v15 }
 0x3c4   :  { %v1119_v52 = vmul.f32 %v1118_v25, %v1117_v46  ;;  %v1087_v63 = vpop.f32.mrf.mxu3  ;;  %v1130_v41 = vrot.slane %v1128_v26, 4 }
 0x3c5   :  { %v1263_v42 = vpop.eup %1262 }
 0x3c6   :  { %v1120_v35 = vmul.f32 %v1119_v52, %v1119_v52  ;;  %v1101_v14 = vmul.f32 %v1263_v42, %v1099_v38  ;;  %vm1106_vm0 = vweird.f32 %v1263_v42 }
 0x3c7   :  { %vm1107_vm2 = vmor %vm1105_vm1, %vm1106_vm0 }
 0x3c8   :  { %v1122_v30 = vrot.slane %v1120_v35, 1  ;;  %v1102_v40 = vsub.f32 1.0, %v1101_v14 }
 0x3ca   :  { %v1124_v0 = vadd.f32 %v1122_v30, %v1120_v35  ;;  %v1103_v45 = vmul.f32 %v1263_v42, %v1102_v40 }
 0x3cc   :  { %v1125_v44 = vmul.f32 -0.5, %v1124_v0  ;;  %v1089_v34 = vpop.f32.mrf.mxu3  ;;  %v1104_v54 = vadd.f32 %v1263_v42, %v1103_v45 }
 0x3ce   :  { %v1126_v55 = vmul.f32 1.442695, %v1125_v44  ;;  %v1108_v29 = vsel %vm1107_vm2, %v1263_v42, %v1104_v54 }
 0x3cf   :  { %v1113_v24 = vsel %vm1110_vm3, %v1112_v60, %v1108_v29 }
 0x3d0   :  { %1264 = vpow2.f32 %v1126_v55 }
 0x3d6   :  { %v1265_v50 = vpop.eup %1264 }
 0x3d7   :  { %v1132_v1 = vmul.f32 %v1265_v50, %v1130_v41 }
 0x3d9   :  { %v1133_v48 = vmul.f32 0.15915494, %v1132_v1 }
 0x3db   :  { %v1142_v53 = vrot.slane %v1133_v48, 3 }
 0x3dd   :  { %v1144_v39 = vmul.f32 %v1142_v53, %v1094_v21 }
 0x3df   :  { %v1152_v19 = vadd.f32 %v1150_v49, %v1144_v39 }
 0x3e1   :  { %v1153_v57 = vmul.f32 %v1152_v19, %v1113_v24 }
 0x3e3   :  { %1155 = vst.msk [vmem:[#allocation2 - $0x3] sm:$0x8] %vm1154_vm4, %v1153_v57 }
 0x3e4   :  { %1166 = dma.vmem_to_hbm [thread:$0]  %s1162_s3, 16, %s1164_s21, [#allocation3]  }
 0x3e5   :  { %1290 = dma.done.wait [#allocation3], 16  }
 0x3e6   :  { %1291 = vsyncadd [#allocation3], 4294967280 }
 0x3e7   :  { %1171 = vsyncpa [#allocation3], 1 }

</bundles_post_ra>
